<compile_context>
chip_gen: v7x
topology: tpu7x:2x2x1
jax: 0.10.0
libtpu: 0.0.40
codegen_flags: <defaults>
</compile_context>

<pallas_src>
import functools

import jax
import jax.numpy as jnp
from jax.experimental import pallas as pl
from jax.experimental.pallas import tpu as pltpu


def _vfl_kernel(pred_ref, gt_ref, label_ref, out_ref, acc_ref, *,
                alpha, gamma, total_rows, needs_mask):
    j = pl.program_id(1)                      # inner (reduction) axis

    @pl.when(j == 0)
    def _():
        acc_ref[...] = jnp.zeros_like(acc_ref)

    # Compute in float32 (matches the torch autocast(enabled=False) region).
    x = pred_ref[...].astype(jnp.float32)     # logits
    z = gt_ref[...].astype(jnp.float32)       # gt_score (targets)
    lbl = label_ref[...]                      # int8 0/1 mask

    # sigmoid via a single tanh (one EUP op, full f32 precision).
    p = 0.5 * (jnp.tanh(0.5 * x) + 1.0)

    # p ** gamma without exp/log for the common cases.
    if gamma == 2.0:
        pg = p * p
    elif float(gamma).is_integer() and gamma > 0:
        pg = p
        for _ in range(int(gamma) - 1):
            pg = pg * p
    else:
        pg = p ** gamma

    # weight = alpha * p^g * (1 - label) + gt * label, with label a 0/1 mask.
    weight = jnp.where(lbl != 0, z, alpha * pg)

    # Stable BCE-with-logits: max(x,0) - x*z + log1p(exp(-|x|));
    # log1p(exp(-|x|)) == -log(sigmoid(|x|)) == -log(max(p, 1-p))  (reuses p).
    bce = jnp.maximum(x, 0.0) - x * z - jnp.log(jnp.maximum(p, 1.0 - p))

    contrib = bce * weight

    if needs_mask:
        tm = contrib.shape[0]
        tile_idx = pl.program_id(0) * pl.num_programs(1) + j
        rows = tile_idx * tm + jax.lax.broadcasted_iota(jnp.int32, (tm, 1), 0)
        contrib = jnp.where(rows < total_rows, contrib, 0.0)

    # Tree-style partial sums: fold rows onto an (8, C) accumulator (VPU adds only).
    tm, c = contrib.shape
    acc_ref[...] += contrib.reshape(tm // 8, 8, c).sum(axis=0)

    # Single cross-lane reduce + scalar store, once per split.
    @pl.when(j == pl.num_programs(1) - 1)
    def _():
        out_ref[...] = jnp.sum(acc_ref[...]).reshape(1, 1, 1)


def _round_up(a, b):
    return ((a + b - 1) // b) * b


def varifocal_loss(pred_score, gt_score, label, alpha=0.75, gamma=2.0,
                   tile_m=1024, num_splits=2):
    """Pallas TPU implementation of VarifocalLoss.forward (sum reduction).

    `num_splits=2` shards the row loop across v7x's two TensorCores (it is a
    harmless outer loop on single-core v5e/v6e).  If you raise `tile_m` far
    beyond ~8K rows, also raise `vmem_limit_bytes` (v5e scoped default: 16 MiB).
    """
    assert pred_score.shape == gt_score.shape == label.shape
    C = pred_score.shape[-1]
    pred2 = pred_score.reshape(-1, C)
    gt2 = gt_score.reshape(-1, C)
    # NOTE: label is treated as a 0/1 mask (as produced by YOLO's assigner);
    # shipping it as int8 cuts HBM read traffic ~25% on this memory-bound kernel.
    lab2 = (label.reshape(-1, C) != 0).astype(jnp.int8)
    M = pred2.shape[0]

    # Effective row tile: big enough to hit the HBM roofline, multiple of 32
    # (int8 sublane packing + in-kernel 8-row fold), but don't over-pad tiny inputs.
    tm = max(32, min(int(tile_m), _round_up(pl.cdiv(M, num_splits), 32)))
    tm = _round_up(tm, 32)

    total_tiles = pl.cdiv(M, tm)
    tiles_per_split = pl.cdiv(total_tiles, num_splits)
    m_pad = num_splits * tiles_per_split * tm
    if m_pad != M:
        pad = m_pad - M
        pred2 = jnp.pad(pred2, ((0, pad), (0, 0)))
        gt2 = jnp.pad(gt2, ((0, pad), (0, 0)))
        lab2 = jnp.pad(lab2, ((0, pad), (0, 0)))

    kernel = functools.partial(
        _vfl_kernel,
        alpha=float(alpha),
        gamma=float(gamma),
        total_rows=M,
        needs_mask=(m_pad != M),
    )

    def in_map(p, i):
        return (p * tiles_per_split + i, 0)

    row_spec = pl.BlockSpec((tm, C), in_map)

    partials = pl.pallas_call(
        kernel,
        out_shape=jax.ShapeDtypeStruct((num_splits, 1, 1), jnp.float32),
        grid_spec=pltpu.PrefetchScalarGridSpec(
            num_scalar_prefetch=0,
            grid=(num_splits, tiles_per_split),
            in_specs=[row_spec, row_spec, row_spec],
            out_specs=pl.BlockSpec((1, 1, 1), lambda p, i: (p, 0, 0)),
            scratch_shapes=[pltpu.VMEM((8, C), jnp.float32)],
        ),
        compiler_params=pltpu.CompilerParams(
            dimension_semantics=("parallel", "arbitrary"),
        ),
    )(pred2, gt2, lab2)
    return jnp.sum(partials)


def _varifocal_loss_ref(pred_score, gt_score, label, alpha=0.75, gamma=2.0):
    """Pure-JAX reference for validation."""
    x = pred_score.astype(jnp.float32)
    z = gt_score.astype(jnp.float32)
    l = label.astype(jnp.float32)
    weight = alpha * jax.nn.sigmoid(x) ** gamma * (1.0 - l) + z * l
    bce = jnp.maximum(x, 0.0) - x * z + jnp.log1p(jnp.exp(-jnp.abs(x)))
    return jnp.sum(bce * weight)


if __name__ == "__main__":
    key = jax.random.PRNGKey(0)

    def make_inputs(k, B, A, C):
        k1, k2, k3 = jax.random.split(k, 3)
        pred = jax.random.normal(k1, (B, A, C), dtype=jnp.float32) * 2.0
        gt = jax.random.uniform(k2, (B, A, C), dtype=jnp.float32)
        lab = (jax.random.uniform(k3, (B, A, C)) > 0.9).astype(jnp.float32)
        return pred, gt, lab

    k0, k1, k2 = jax.random.split(key, 3)

    # 1) Small shape consistent with the module: (batch, anchors, classes).
    p, g, l = make_inputs(k0, 2, 8, 128)
    out = jax.block_until_ready(varifocal_loss(p, g, l))
    ref = _varifocal_loss_ref(p, g, l)
    assert jnp.allclose(out, ref, rtol=1e-5, atol=1e-3), (out, ref)

    # 2) Ragged row count (exercises padding + in-kernel row mask) and a
    #    multi-step inner reduction axis via a small explicit tile.
    p, g, l = make_inputs(k1, 2, 83, 128)
    out = jax.block_until_ready(varifocal_loss(p, g, l, tile_m=32))
    ref = _varifocal_loss_ref(p, g, l)
    assert jnp.allclose(out, ref, rtol=1e-5, atol=1e-3), (out, ref)

    # 3) Non-default alpha / integer gamma (repeated-multiply fast path).
    p, g, l = make_inputs(k2, 2, 16, 128)
    out = jax.block_until_ready(varifocal_loss(p, g, l, alpha=0.5, gamma=3.0))
    ref = _varifocal_loss_ref(p, g, l, alpha=0.5, gamma=3.0)
    assert jnp.allclose(out, ref, rtol=1e-5, atol=1e-3), (out, ref)

    print("KERNEL_OK")
</pallas_src>

<mosaic_0001>
module attributes {stable_mosaic.version = 11 : i64} {
  func.func @_vfl_kernel(%arg0: i32, %arg1: i32, %arg2: memref<32x128xf32, #tpu.memory_space<vmem>>, %arg3: memref<32x128xf32, #tpu.memory_space<vmem>>, %arg4: memref<32x128xi8, #tpu.memory_space<vmem>>, %arg5: memref<1x1x1xf32, #tpu.memory_space<vmem>>, %arg6: memref<8x128xf32, #tpu.memory_space<vmem>>) attributes {dimension_semantics = [#tpu.dimension_semantics<parallel>, #tpu.dimension_semantics<arbitrary>], iteration_bounds = array<i64: 2, 1>, scalar_prefetch = 0 : i64, scratch_operands = 1 : i64, tpu.core_type = #tpu.core_type<tc>, window_params = [{transform_indices = @transform_0, window_bounds = array<i64: 32, 128>}, {transform_indices = @transform_1, window_bounds = array<i64: 32, 128>}, {transform_indices = @transform_2, window_bounds = array<i64: 32, 128>}, {transform_indices = @transform_3, window_bounds = array<i64: 1, 1, 1>}]} {
    %c0_i32 = arith.constant 0 : i32
    %0 = arith.cmpi eq, %arg1, %c0_i32 : i32
    %1 = arith.extui %0 : i1 to i32
    %c0_i32_0 = arith.constant 0 : i32
    %2 = arith.cmpi ne, %1, %c0_i32_0 : i32
    scf.if %2 {
      %cst_19 = arith.constant 0.000000e+00 : f32
      %49 = vector.broadcast %cst_19 : f32 to vector<8x128xf32>
      %c0_20 = arith.constant 0 : index
      %c0_21 = arith.constant 0 : index
      %50 = vector.load %arg6[%c0_20, %c0_21] : memref<8x128xf32, #tpu.memory_space<vmem>>, vector<8x128xf32>
      tpu.vector_store %arg6[%c0_20, %c0_21], %49 {strides = array<i32>} : memref<8x128xf32, #tpu.memory_space<vmem>>, vector<8x128xf32>,
    } else {
    }
    %c0 = arith.constant 0 : index
    %c0_1 = arith.constant 0 : index
    %3 = vector.load %arg2[%c0, %c0_1] : memref<32x128xf32, #tpu.memory_space<vmem>>, vector<32x128xf32>
    %c0_2 = arith.constant 0 : index
    %c0_3 = arith.constant 0 : index
    %4 = vector.load %arg3[%c0_2, %c0_3] : memref<32x128xf32, #tpu.memory_space<vmem>>, vector<32x128xf32>
    %c0_4 = arith.constant 0 : index
    %c0_5 = arith.constant 0 : index
    %5 = vector.load %arg4[%c0_4, %c0_5] : memref<32x128xi8, #tpu.memory_space<vmem>>, vector<32x128xi8>
    %cst = arith.constant 5.000000e-01 : f32
    %6 = vector.broadcast %cst : f32 to vector<32x128xf32>
    %7 = arith.mulf %6, %3 : vector<32x128xf32>
    %8 = math.tanh %7 : vector<32x128xf32>
    %cst_6 = arith.constant 1.000000e+00 : f32
    %9 = vector.broadcast %cst_6 : f32 to vector<32x128xf32>
    %10 = arith.addf %8, %9 : vector<32x128xf32>
    %cst_7 = arith.constant 5.000000e-01 : f32
    %11 = vector.broadcast %cst_7 : f32 to vector<32x128xf32>
    %12 = arith.mulf %11, %10 : vector<32x128xf32>
    %13 = arith.mulf %12, %12 : vector<32x128xf32>
    %c0_i8 = arith.constant 0 : i8
    %14 = vector.broadcast %c0_i8 : i8 to vector<32x128xi8>
    %15 = arith.cmpi ne, %5, %14 : vector<32x128xi8>
    %cst_8 = arith.constant 7.500000e-01 : f32
    %16 = vector.broadcast %cst_8 : f32 to vector<32x128xf32>
    %17 = arith.mulf %16, %13 : vector<32x128xf32>
    %18 = arith.select %15, %4, %17 : vector<32x128xi1>, vector<32x128xf32>
    %cst_9 = arith.constant 0.000000e+00 : f32
    %19 = vector.broadcast %cst_9 : f32 to vector<32x128xf32>
    %20 = arith.maximumf %3, %19 : vector<32x128xf32>
    %21 = arith.mulf %3, %4 : vector<32x128xf32>
    %22 = arith.subf %20, %21 : vector<32x128xf32>
    %cst_10 = arith.constant 1.000000e+00 : f32
    %23 = vector.broadcast %cst_10 : f32 to vector<32x128xf32>
    %24 = arith.subf %23, %12 : vector<32x128xf32>
    %25 = arith.maximumf %12, %24 : vector<32x128xf32>
    %26 = math.log %25 : vector<32x128xf32>
    %27 = arith.subf %22, %26 : vector<32x128xf32>
    %28 = arith.mulf %27, %18 : vector<32x128xf32>
    %c1_i32 = arith.constant 1 : i32
    %29 = arith.muli %arg0, %c1_i32 : i32
    %30 = arith.addi %29, %arg1 : i32
    %c32_i32 = arith.constant 32 : i32
    %31 = arith.muli %30, %c32_i32 : i32
    %32 = tpu.iota {dimensions = array<i32: 0>} : vector<32x1xi32>
    %33 = vector.broadcast %31 : i32 to vector<32x1xi32>
    %34 = arith.addi %33, %32 : vector<32x1xi32>
    %c16_i32 = arith.constant 16 : i32
    %35 = vector.broadcast %c16_i32 : i32 to vector<32x1xi32>
    %36 = arith.cmpi slt, %34, %35 : vector<32x1xi32>
    %cst_11 = arith.constant 0.000000e+00 : f32
    %37 = vector.shape_cast %36 : vector<32x1xi1> to vector<32x1xi1>
    %38 = vector.broadcast %37 : vector<32x1xi1> to vector<32x128xi1>
    %39 = vector.broadcast %cst_11 : f32 to vector<32x128xf32>
    %40 = arith.select %38, %28, %39 : vector<32x128xi1>, vector<32x128xf32>
    %c0_12 = arith.constant 0 : index
    %c0_13 = arith.constant 0 : index
    %41 = vector.load %arg6[%c0_12, %c0_13] : memref<8x128xf32, #tpu.memory_space<vmem>>, vector<8x128xf32>
    %42 = vector.shape_cast %40 : vector<32x128xf32> to vector<4x8x128xf32>
    %cst_14 = arith.constant dense<0.000000e+00> : vector<8x128xf32>
    %43 = vector.multi_reduction <add>, %42, %cst_14 [0] : vector<4x8x128xf32> to vector<8x128xf32>
    %44 = arith.addf %41, %43 : vector<8x128xf32>
    %c0_15 = arith.constant 0 : index
    %c0_16 = arith.constant 0 : index
    %45 = vector.load %arg6[%c0_15, %c0_16] : memref<8x128xf32, #tpu.memory_space<vmem>>, vector<8x128xf32>
    tpu.vector_store %arg6[%c0_15, %c0_16], %44 {strides = array<i32>} : memref<8x128xf32, #tpu.memory_space<vmem>>, vector<8x128xf32>,
    %c0_i32_17 = arith.constant 0 : i32
    %46 = arith.cmpi eq, %arg1, %c0_i32_17 : i32
    %47 = arith.extui %46 : i1 to i32
    %c0_i32_18 = arith.constant 0 : i32
    %48 = arith.cmpi ne, %47, %c0_i32_18 : i32
    scf.if %48 {
      %c0_19 = arith.constant 0 : index
      %c0_20 = arith.constant 0 : index
      %49 = vector.load %arg6[%c0_19, %c0_20] : memref<8x128xf32, #tpu.memory_space<vmem>>, vector<8x128xf32>
      %50 = vector.shape_cast %49 : vector<8x128xf32> to vector<1x8x128xf32>
      %cst_21 = arith.constant dense<0.000000e+00> : vector<1xf32>
      %51 = vector.multi_reduction <add>, %50, %cst_21 [1, 2] : vector<1x8x128xf32> to vector<1xf32>
      %52 = vector.shape_cast %51 : vector<1xf32> to vector<1x1x1xf32>
      %53 = vector.extract %52[0, 0, 0] : f32 from vector<1x1x1xf32>
      %54 = vector.broadcast %53 : f32 to vector<1x1x1xf32>
      %c0_22 = arith.constant 0 : index
      %c0_23 = arith.constant 0 : index
      %c0_24 = arith.constant 0 : index
      %55 = vector.load %arg5[%c0_22, %c0_23, %c0_24] : memref<1x1x1xf32, #tpu.memory_space<vmem>>, vector<1x1x1xf32>
      tpu.vector_store %arg5[%c0_22, %c0_23, %c0_24], %54 {strides = array<i32>} : memref<1x1x1xf32, #tpu.memory_space<vmem>>, vector<1x1x1xf32>,
    } else {
    }
    return
  }
  func.func @transform_0(%arg0: i32, %arg1: i32) -> (i32, i32) {
    %c1_i32 = arith.constant 1 : i32
    %0 = arith.muli %arg0, %c1_i32 : i32
    %1 = arith.addi %0, %arg1 : i32
    %c0_i32 = arith.constant 0 : i32
    %c0_i32_0 = arith.constant 0 : i32
    return %1, %c0_i32 : i32, i32
  }
  func.func @transform_1(%arg0: i32, %arg1: i32) -> (i32, i32) {
    %c1_i32 = arith.constant 1 : i32
    %0 = arith.muli %arg0, %c1_i32 : i32
    %1 = arith.addi %0, %arg1 : i32
    %c0_i32 = arith.constant 0 : i32
    %c0_i32_0 = arith.constant 0 : i32
    return %1, %c0_i32 : i32, i32
  }
  func.func @transform_2(%arg0: i32, %arg1: i32) -> (i32, i32) {
    %c1_i32 = arith.constant 1 : i32
    %0 = arith.muli %arg0, %c1_i32 : i32
    %1 = arith.addi %0, %arg1 : i32
    %c0_i32 = arith.constant 0 : i32
    %c0_i32_0 = arith.constant 0 : i32
    return %1, %c0_i32 : i32, i32
  }
  func.func @transform_3(%arg0: i32, %arg1: i32) -> (i32, i32, i32) {
    %c0_i32 = arith.constant 0 : i32
    %c0_i32_0 = arith.constant 0 : i32
    %c0_i32_1 = arith.constant 0 : i32
    return %arg0, %c0_i32, %c0_i32_0 : i32, i32, i32
  }
}

</mosaic_0001>

<bundles_post_ra>
// kernel: tpu_custom_call.1
= control target key start
LH: loop header
LB: loop body
LE: loop exit
PB: predicated region body
PF: predicated region fallthrough
CT: control target
= control target key end

     0   :  { %8 = vsyncpa [#allocation4], 0  ;;  %s1118_s0 = inlined_call_operand.hbm [shape: f32[64,128], index: 0, kind: input, shape index: {}]   ;;  %s1119_s1 = inlined_call_operand.hbm [shape: f32[64,128], index: 1, kind: input, shape index: {}]   ;;  %s1120_s2 = inlined_call_operand.hbm [shape: s8[64,128], index: 2, kind: input, shape index: {}]   ;;  %s1121_s3 = inlined_call_operand.vmem [shape: f32[2,1,1], index: 3, kind: output, shape index: {}]  }
   0x1   :  { %10 = vsyncpa [#allocation4 + $0x1], 0 }
   0x2   :  { %11 = vsyncpa [#allocation6], 0 }
   0x3   :  { %13 = vsyncpa [#allocation6 + $0x1], 0  ;;  %s839_s12 = smov 0   ;;  %s841_s13 = smov 0  }
   0x4   :  { %s843_s14 = smov 0   ;;  %s845_s15 = smov 0  }
   0x5   :  { %s847_s16 = smov 0   ;;  %s849_s17 = smov 0  }
   0x6 LB: > { %s1123_s18 = sadd.s32 4294967295, %s811_s17   ;;  %s31_s19 = sadd.s32 1, %s807_s16  ;;  %s811_s17 = sphi %s849_s17, %s19_s17   ;;  %s807_s16 = sphi %s847_s16, %s1150_s16   ;;  %s803_s15 = sphi %s845_s15, %s1149_s15   ;;  %s799_s14 = sphi %s843_s14, %s1148_s14   ;;  %s795_s13 = sphi %s841_s13, %s1147_s13   ;;  %s791_s12 = sphi %s839_s12, %s1146_s12  }
   0x7   : > { %p33_p0 = scmp.ge.s32.totalorder %s31_s19, 2  ;;  %s40_s20 = sadd.s32 1, %s799_s14 }
   0x8   : > { %p47_p1 = scmp.ne.s32.totalorder %s799_s14, %s795_s13  ;;  %p48_p2 = scmp.eq.s32.totalorder %s811_s17, 0 }
   0x9   : > { %s1152_s19 = smov (%p33_p0, %s31_s19), 0  ;;  %p53_p4 = scmp.ne.s32.totalorder %s795_s13, %s791_s12 }
   0xa   : > { %p49_p3 = por %p48_p2, %p47_p1  ;;  %s37_s21 = ssub.s32 %s807_s16, %s1152_s19 }
   0xb   : > { %p54_p5 = scmp.eq.s32.totalorder %s1123_s18, 0  ;;  %p38_p6 = scmp.eq.s32.totalorder %s37_s21, 0 }
   0xc   : > { %p599_p8 = scmp.lt.s32.totalorder %s811_s17, 2  ;;  %s889_s24 = sand.u32 1, %s799_s14  }
   0xd   : > { %p880_p7 = por %p54_p5, %p53_p4  ;;  %s579_s25 = sshll.u32 %s807_s16, 9 }
   0xe   : > { %s886_s23 = scalar_select %p38_p6, %s799_s14, %s40_s20  }
   0xf   : > { %s1125_s22 = scalar_select %p880_p7, 1, 0 }
  0x10   : > { %s564_s26 = sshll.u32 %s889_s24, 5  ;;  %p893_p9 = pnand %p599_p8, %p49_p3 }
  0x11   : > { %s181_s28 = sand.u32 1, %s811_s17   ;;  %s903_s4 = scalar_lea.hbm %s1119_s1, %s579_s25 }
  0x12   : > { %s1126_s27 = scalar_select %p893_p9, 1, 0 }
  0x13   : > { %s185_s5 = scalar_lea.vmem [#allocation5], %s564_s26  ;;  %s910_s7 = scalar_lea.sflag [#allocation6], %s181_s28 }
  0x14   : > { %s193_s6 = sshll.u32 %s185_s5, 4  ;;  %s667_s8 = scalar_lea.hbm %s903_s4, 512  ;;  %s907_s6 = int_to_ptr.vmem [resolvable:$true] %s193_s6 }
  0x15   : > { %p668_p11 = scmp.ne.s32.totalorder %s903_s4, %s667_s8  ;;  %p916_p12 = pneg %p893_p9 }
  0x16   : > { %s672_s12 = scalar_lea.hbm %s1119_s1, 1024  ;;  %p673_p1 = scmp.lt.u32.totalorder %s903_s4, %s1119_s1 }
  0x17   : > { %p670_p13 = pnand %p916_p12, %p668_p11  ;;  %p674_p2 = scmp.lt.u32.totalorder %s672_s12, %s667_s8 }
  0x18   : > { %p676_p4 = scmp.lt.u32.totalorder %s667_s8, %s903_s4 }
  0x19   : > { %p671_p0 = pneg %p670_p13  ;;  %p675_p3 = por %p674_p2, %p673_p1 }
  0x1b   : > { %p677_p5 = por %p676_p4, %p675_p3 }
  0x1d   : > { %p678_p6 = pnand %p677_p5, %p671_p0 }
  0x1f   : > { %681 = shalt.err (!%p678_p6)
}
  0x20   : > { %s682_s28 = scalar_lea.vmem %s907_s6, 512  ;;  %s813_s29 = smov [#allocation5]  }
  0x21   : > { %p683_p8 = scmp.ne.s32.totalorder %s907_s6, %s682_s28  ;;  %s687_s30 = sshll.u32 %s813_s29, 4  ;;  %s688_s30 = int_to_ptr.vmem [resolvable:$false] %s687_s30 }
  0x22   : > { %s689_s5 = scalar_lea.vmem %s688_s30, 1024  ;;  %p690_p10 = scmp.lt.s32.totalorder %s907_s6, %s688_s30 }
  0x23   : > { %p685_p11 = pnand %p683_p8, %p916_p12  ;;  %p691_p7 = scmp.lt.s32.totalorder %s689_s5, %s682_s28 }
  0x25   : > { %p686_p13 = pneg %p685_p11  ;;  %p692_p1 = por %p691_p7, %p690_p10 }
  0x27   : > { %p693_p2 = pnand %p692_p1, %p686_p13 }
  0x29   : > { %696 = shalt.err (!%p693_p2)
}
  0x2a   : > { %s814_s8 = smov 128   ;;  %s815_s10 = smov 8  }
  0x2b   : > { %595 = dma.hbm_to_vmem [thread:$0]  (!%p893_p9), %s903_s4, 512, %s907_s6, %s910_s7, %s814_s8, %s814_s8, %s815_s10  }
  0x2c   : > { %p220_p7 = scmp.lt.s32.totalorder %s811_s17, 3  ;;  %p1128_p10 = scmp.ge.s32.totalorder %s811_s17, 1 }
  0x2d   : > { %s955_s21 = scalar_lea.hbm %s1118_s0, %s579_s25  ;;  %s163_s28 = scalar_lea.vmem [#allocation3], %s564_s26 }
  0x2e   : > { %p946_p0 = pnand %p1128_p10, %p220_p7  ;;  %s171_s29 = sshll.u32 %s163_s28, 4  ;;  %s959_s29 = int_to_ptr.vmem [resolvable:$true] %s171_s29 }
  0x2f   : > { %s570_s4 = sshll.u32 %s889_s24, 3  ;;  %s160_s6 = scalar_lea.sflag [#allocation4], %s889_s24 }
  0x30   : > { %s1129_s11 = scalar_select %p946_p0, 1, 0 }
  0x31   : > { %s697_s30 = scalar_lea.hbm %s955_s21, 512  ;;  %s702_s25 = scalar_lea.hbm %s1118_s0, 1024 }
  0x32   : > { %p698_p3 = scmp.ne.s32.totalorder %s955_s21, %s697_s30  ;;  %p703_p6 = scmp.lt.u32.totalorder %s955_s21, %s1118_s0 }
  0x33   : > { %p704_p8 = scmp.lt.u32.totalorder %s702_s25, %s697_s30  ;;  %p706_p13 = scmp.lt.u32.totalorder %s697_s30, %s955_s21 }
  0x34   : > { %p700_p4 = pnand %p698_p3, %p916_p12 }
  0x35   : > { %p705_p11 = por %p704_p8, %p703_p6 }
  0x36   : > { %p701_p5 = pneg %p700_p4 }
  0x37   : > { %p707_p1 = por %p706_p13, %p705_p11 }
  0x39   : > { %p708_p2 = pnand %p707_p1, %p701_p5 }
  0x3b   : > { %711 = shalt.err (!%p708_p2)
}
  0x3c   : > { %s712_s26 = scalar_lea.vmem %s959_s29, 512  ;;  %s816_s28 = smov [#allocation3]  }
  0x3d   : > { %p713_p7 = scmp.ne.s32.totalorder %s959_s29, %s712_s26  ;;  %s717_s5 = sshll.u32 %s816_s28, 4  ;;  %s718_s5 = int_to_ptr.vmem [resolvable:$false] %s717_s5 }
  0x3e   : > { %s719_s18 = scalar_lea.vmem %s718_s5, 1024  ;;  %p720_p4 = scmp.lt.s32.totalorder %s959_s29, %s718_s5 }
  0x3f   : > { %p715_p10 = pnand %p713_p7, %p916_p12  ;;  %p721_p0 = scmp.lt.s32.totalorder %s719_s18, %s712_s26 }
  0x41   : > { %p716_p3 = pneg %p715_p10  ;;  %p722_p6 = por %p721_p0, %p720_p4 }
  0x43   : > { %p723_p8 = pnand %p722_p6, %p716_p3 }
  0x45   : > { %726 = shalt.err (!%p723_p8)
}
  0x46   : > { %592 = dma.hbm_to_vmem [thread:$0]  (!%p893_p9), %s955_s21, 512, %s959_s29, %s160_s6, %s814_s8, %s814_s8, %s815_s10  }
  0x47   : > { %s571_s30 = sshll.u32 %s807_s16, 7  ;;  %s207_s26 = scalar_lea.vmem [#allocation7], %s570_s4 }
  0x48   : > { %s993_s20 = scalar_lea.hbm %s1120_s2, %s571_s30  ;;  %s215_s28 = sshll.u32 %s207_s26, 4  ;;  %s216_s28 = int_to_ptr.vmem [resolvable:$true] %s215_s28 }
  0x49   : > { %s727_s5 = scalar_lea.hbm %s993_s20, 128  ;;  %s732_s21 = scalar_lea.hbm %s1120_s2, 256 }
  0x4a   : > { %p728_p0 = scmp.ne.s32.totalorder %s993_s20, %s727_s5  ;;  %p733_p13 = scmp.lt.u32.totalorder %s993_s20, %s1120_s2 }
  0x4b   : > { %p734_p1 = scmp.lt.u32.totalorder %s732_s21, %s727_s5  ;;  %p736_p7 = scmp.lt.u32.totalorder %s727_s5, %s993_s20 }
  0x4c   : > { %p730_p5 = pnand %p728_p0, %p916_p12 }
  0x4d   : > { %p735_p2 = por %p734_p1, %p733_p13 }
  0x4e   : > { %p731_p11 = pneg %p730_p5 }
  0x4f   : > { %p737_p10 = por %p736_p7, %p735_p2 }
  0x51   : > { %p738_p3 = pnand %p737_p10, %p731_p11 }
  0x53   : > { %741 = shalt.err (!%p738_p3)
}
  0x54   : > { %s742_s24 = scalar_lea.vmem %s216_s28, 128  ;;  %s817_s4 = smov [#allocation7]  }
  0x55   : > { %p743_p4 = scmp.ne.s32.totalorder %s216_s28, %s742_s24  ;;  %s747_s18 = sshll.u32 %s817_s4, 4  ;;  %s748_s18 = int_to_ptr.vmem [resolvable:$false] %s747_s18 }
  0x56   : > { %s749_s30 = scalar_lea.vmem %s748_s18, 256  ;;  %p750_p0 = scmp.lt.s32.totalorder %s216_s28, %s748_s18 }
  0x57   : > { %p745_p6 = pnand %p743_p4, %p916_p12  ;;  %p751_p5 = scmp.lt.s32.totalorder %s749_s30, %s742_s24 }
  0x59   : > { %p746_p8 = pneg %p745_p6  ;;  %p752_p9 = por %p751_p5, %p750_p0 }
  0x5b   : > { %p753_p1 = pnand %p752_p9, %p746_p8 }
  0x5d   : > { %756 = shalt.err (!%p753_p1)
}
  0x5e   : > { %p1130_p13 = scmp.ne.s32.totalorder %s1126_s27, 0  ;;  %p1131_p11 = scmp.ne.s32.totalorder %s1129_s11, 0 }
  0x5f   : > { %s226_s9 = sand.u32 (!%p1131_p11), 1, %s795_s13   ;;  %p1132_p12 = scmp.ne.s32.totalorder (!%p1131_p11), %s1125_s22, 0 }
  0x60   : > { %598 = dma.hbm_to_vmem [thread:$0]  (!%p1130_p13), %s993_s20, 128, %s216_s28, %s910_s7  }
  0x61   : > { %224 = sbr.rel (%p1131_p11) target bundleno = 362 (0x16a), region = 32  ;;  %s573_s12 = sshll.u32 (!%p1131_p11), %s226_s9, 5 }
  0x62   : > { %s227_s25 = scalar_lea.sflag (!%p1131_p11), [#allocation4], %s226_s9  ;;  %s230_s26 = scalar_lea.vmem (!%p1131_p11), [#allocation3], %s573_s12 }
  0x68   : > { %782 = dma.done.wait (%p1132_p12), %s227_s25, 512  }
  0x69   : > { %784 = vsyncadd (%p1132_p12), %s227_s25, 4294966784  ;;  %s1133_s5 = sadd.s32 4294967295, %s811_s17   ;;  %s1024_s7 = scalar_lea.vmem [#allocation5], %s573_s12 }
  0x6a   : > { %s235_s27 = sand.u32 1, %s1133_s5  }
  0x6b   : > { %s236_s8 = scalar_lea.sflag [#allocation6], %s235_s27 }
  0x6c   : > { %786 = dma.done.wait (%p1132_p12), %s236_s8, 640  }
  0x6d   : > { %788 = vsyncadd (%p1132_p12), %s236_s8, 4294966656  ;;  %s575_s11 = sshll.u32 %s226_s9, 3  ;;  %v1030_v0 = vld [vmem:[%s230_s26] sm:$0xff]  ;;  %v1032_v1 = vld [vmem:[%s230_s26 + $0x8] sm:$0xff]  ;;  %v818_v9 = vmov 0   ;;  %v399_v27 = vlaneseq  ;;  %s576_s22 = sshll.u32 %s803_s15, 5 }
  0x6e   : > { %v1034_v2 = vld [vmem:[%s230_s26 + $0x10] sm:$0xff]  ;;  %v1036_v3 = vld [vmem:[%s230_s26 + $0x18] sm:$0xff]  ;;  %v303_v4 = vmul.f32 0.5, %v1030_v0  ;;  %v304_v5 = vmul.f32 0.5, %v1032_v1  ;;  %s248_s20 = scalar_lea.vmem [#allocation7], %s575_s11  ;;  %v404_v46 = vstv %s576_s22  ;;  %v1048_v47 = vld [vmem:[%s1024_s7] sm:$0xff] }
  0x6f   : > { %v305_v6 = vmul.f32 0.5, %v1034_v2  ;;  %v302_v7 = vld [vmem:[%s248_s20] sm:$0xff]  ;;  %v306_v8 = vmul.f32 0.5, %v1036_v3  ;;  %v400_v40 = vshrl.u32 %v399_v27, 7  ;;  %v300_v55 = vld [vmem:[%s1024_s7 + $0x10] sm:$0xff]  ;;  %v361_v58 = vmax.f32 %v1030_v0, 0.0 }
  0x70   : > { %651 = vtanh.f32 %v303_v4  ;;  %vm323_vm0 = vnez %v302_v7  ;;  %v299_v51 = vld [vmem:[%s1024_s7 + $0x8] sm:$0xff]  ;;  %v301_v60 = vld [vmem:[%s1024_s7 + $0x18] sm:$0xff]  ;;  %v365_v4 = vmul.f32 %v1048_v47, %v1030_v0  ;;  %v362_v7 = vmax.f32 %v1032_v1, 0.0  ;;  %p284_p9 = scmp.lt.s32.totalorder %s803_s15, 1 }
  0x71   : > { %653 = vtanh.f32 %v304_v5  ;;  %v328_v10 = vsel %vm323_vm0, 16843009, %v818_v9  ;;  %v401_v50 = vadd.s32 8, %v400_v40  ;;  %v402_v53 = vadd.s32 16, %v400_v40 }
  0x72   : > { %655 = vtanh.f32 %v305_v6  ;;  %v329_v11 = vunpack.c.0.s8 %v328_v10  ;;  %v330_v12 = vunpack.c.1.s8 %v328_v10  ;;  %v331_v13 = vunpack.c.2.s8 %v328_v10  ;;  %s1154_s15 = smov (!%p284_p9, %s803_s15), 1 }
  0x73   : > { %657 = vtanh.f32 %v306_v8  ;;  %v332_v14 = vunpack.c.3.s8 %v328_v10  ;;  %v403_v54 = vadd.s32 24, %v400_v40  ;;  %v405_v59 = vadd.s32 %v404_v46, %v400_v40  ;;  %s286_s21 = scalar_lea.vmem %s1121_s3, %s1154_s15 }
  0x74   : > { %v333_v16 = vpack.c.b16 %v329_v11, %v329_v11  ;;  %v335_v19 = vpack.c.b16 %v330_v12, %v330_v12  ;;  %v337_v22 = vpack.c.b16 %v331_v13, %v331_v13  ;;  %v366_v8 = vmul.f32 %v299_v51, %v1032_v1 }
  0x75   : > { %v339_v26 = vpack.c.b16 %v332_v14, %v332_v14  ;;  %v363_v12 = vmax.f32 %v1034_v2, 0.0  ;;  %v367_v13 = vmul.f32 %v300_v55, %v1034_v2  ;;  %vm409_vm9 = vcmp.lt.s32.totalorder %v405_v59, 16 }
  0x76   : > { %v334_v30 = vpack.c.b8 %v333_v16, %v333_v16  ;;  %v336_v32 = vpack.c.b8 %v335_v19, %v335_v19  ;;  %v338_v35 = vpack.c.b8 %v337_v22, %v337_v22  ;;  %v368_v16 = vmul.f32 %v301_v60, %v1036_v3 }
  0x77   : > { %v340_v37 = vpack.c.b8 %v339_v26, %v339_v26  ;;  %v406_v19 = vadd.s32 %v404_v46, %v401_v50  ;;  %v370_v2 = vsub.f32 %v362_v7, %v366_v8  ;;  %v407_v22 = vadd.s32 %v404_v46, %v402_v53 }
  0x78   : > { %vm341_vm1 = vnez %v334_v30  ;;  %vm342_vm2 = vnez %v336_v32  ;;  %vm1043_vm3 = vnez %v338_v35  ;;  %vm445_vm13 = vcmask 0  }
  0x79   : > { %vm1050_vm4 = vnez %v340_v37  ;;  %v345_v49 = vsel %vm341_vm1, 16843009, %v818_v9  ;;  %v346_v52 = vsel %vm342_vm2, 16843009, %v818_v9  ;;  %v347_v57 = vsel %vm1043_vm3, 16843009, %v818_v9 }
  0x7a   : > { %v652_v15 = vpop.eup %651  ;;  %v348_v62 = vsel %vm1050_vm4, 16843009, %v818_v9  ;;  %v349_v63 = vunpack.c.0.s8 %v345_v49  ;;  %v350_v6 = vunpack.c.0.s8 %v346_v52  ;;  %v351_v11 = vunpack.c.0.s8 %v347_v57 }
  0x7b   : > { %v654_v17 = vpop.eup %653  ;;  %v311_v18 = vadd.f32 1.0, %v652_v15  ;;  %v352_v15 = vunpack.c.0.s8 %v348_v62  ;;  %v364_v9 = vmax.f32 %v1036_v3, 0.0  ;;  %v371_v3 = vsub.f32 %v363_v12, %v367_v13 }
  0x7c   : > { %v656_v20 = vpop.eup %655  ;;  %v312_v21 = vadd.f32 1.0, %v654_v17  ;;  %vm1070_vm5 = vcmp.ne.s32.totalorder %v349_v63, 0  ;;  %vm1074_vm6 = vcmp.ne.s32.totalorder %v350_v6, 0  ;;  %vm1078_vm7 = vcmp.ne.s32.totalorder %v351_v11, 0 }
  0x7d   : > { %v658_v23 = vpop.eup %657  ;;  %v313_v24 = vadd.f32 1.0, %v656_v20  ;;  %v315_v25 = vmul.f32 0.5, %v311_v18  ;;  %v369_v18 = vsub.f32 %v361_v58, %v365_v4  ;;  %vm1082_vm8 = vcmp.ne.s32.totalorder %v352_v15, 0 }
  0x7e   : > { %v314_v28 = vadd.f32 1.0, %v658_v23  ;;  %v316_v29 = vmul.f32 0.5, %v312_v21  ;;  %v372_v30 = vsub.f32 %v364_v9, %v368_v16  ;;  %vm410_vm10 = vcmp.lt.s32.totalorder %v406_v19, 16 }
  0x7f   : > { %v317_v31 = vmul.f32 0.5, %v313_v24  ;;  %v373_v33 = vsub.f32 1.0, %v315_v25  ;;  %v319_v56 = vmul.f32 %v315_v25, %v315_v25  ;;  %vm411_vm11 = vcmp.lt.s32.totalorder %v407_v22, 16 }
  0x80   : > { %v318_v34 = vmul.f32 0.5, %v314_v28  ;;  %v374_v36 = vsub.f32 1.0, %v316_v29  ;;  %v320_v61 = vmul.f32 %v316_v29, %v316_v29 }
  0x81   : > { %v375_v38 = vsub.f32 1.0, %v317_v31  ;;  %v377_v39 = vmax.f32 %v315_v25, %v373_v33  ;;  %v321_v5 = vmul.f32 %v317_v31, %v317_v31  ;;  %v324_v14 = vmul.f32 0.75, %v319_v56 }
  0x82   : > { %v376_v41 = vsub.f32 1.0, %v318_v34  ;;  %v378_v42 = vmax.f32 %v316_v29, %v374_v36  ;;  %v322_v10 = vmul.f32 %v318_v34, %v318_v34  ;;  %v325_v17 = vmul.f32 0.75, %v320_v61 }
  0x83   : > { %v379_v43 = vmax.f32 %v317_v31, %v375_v38  ;;  %659 = vlog2.f32 %v377_v39  ;;  %v326_v20 = vmul.f32 0.75, %v321_v5  ;;  %v357_v29 = vsel %vm1070_vm5, %v1048_v47, %v324_v14 }
  0x84   : > { %v380_v45 = vmax.f32 %v318_v34, %v376_v41  ;;  %661 = vlog2.f32 %v378_v42  ;;  %v327_v24 = vmul.f32 0.75, %v322_v10  ;;  %v358_v33 = vsel %vm1074_vm6, %v299_v51, %v325_v17 }
  0x85   : > { %663 = vlog2.f32 %v379_v43  ;;  %v408_v36 = vadd.s32 %v404_v46, %v403_v54  ;;  %v359_v37 = vsel %vm1078_vm7, %v300_v55, %v326_v20 }
  0x86   : > { %665 = vlog2.f32 %v380_v45  ;;  %v360_v40 = vsel %vm1082_vm8, %v301_v60, %v327_v24 }
  0x87   : > { %vm412_vm12 = vcmp.lt.s32.totalorder %v408_v36, 16 }
  0x8d   : > { %v660_v1 = vpop.eup %659 }
  0x8e   : > { %v662_v23 = vpop.eup %661  ;;  %v382_v26 = vmul.f32 0.6931472, %v660_v1 }
  0x8f   : > { %v664_v27 = vpop.eup %663  ;;  %v384_v31 = vmul.f32 0.6931472, %v662_v23 }
  0x90   : > { %v666_v32 = vpop.eup %665  ;;  %v386_v34 = vmul.f32 0.6931472, %v664_v27  ;;  %v389_v35 = vsub.f32 %v369_v18, %v382_v26 }
  0x91   : > { %v388_v38 = vmul.f32 0.6931472, %v666_v32  ;;  %v390_v39 = vsub.f32 %v370_v2, %v384_v31 }
  0x92   : > { %v391_v41 = vsub.f32 %v371_v3, %v386_v34  ;;  %v393_v42 = vmul.f32 %v389_v35, %v357_v29 }
  0x93   : > { %v392_v43 = vsub.f32 %v372_v30, %v388_v38  ;;  %v394_v44 = vmul.f32 %v390_v39, %v358_v33 }
  0x94   : > { %v395_v45 = vmul.f32 %v391_v41, %v359_v37  ;;  %v421_v47 = vsel %vm409_vm9, %v393_v42, 0.0 }
  0x95   : > { %v396_v48 = vmul.f32 %v392_v43, %v360_v40  ;;  %v422_v46 = vsel %vm410_vm10, %v394_v44, 0.0 }
  0x96   : > { %v423_v49 = vsel %vm411_vm11, %v395_v45, 0.0  ;;  %v426_v50 = vadd.f32 %v422_v46, %v421_v47 }
  0x97   : > { %v424_v51 = vsel %vm412_vm12, %v396_v48, 0.0 }
  0x98   : > { %v427_v52 = vadd.f32 %v426_v50, %v423_v49 }
  0x9a   : > { %v428_v53 = vadd.f32 %v427_v52, %v424_v51 }
  0x9c   : > { %435 = vadd.xlane.f32.xlu0 %v428_v53 }
 0x129   : > { %v436_v54 = vpop.xlane.xlu0 %435 }
 0x12a   : > { %v437_v55 = vrot.slane %v436_v54, 4 }
 0x12c   : > { %v438_v56 = vadd.f32 %v437_v55, %v436_v54 }
 0x12e   : > { %v439_v57 = vrot.slane %v438_v56, 2 }
 0x130   : > { %v440_v58 = vadd.f32 %v439_v57, %v438_v56 }
 0x132   : > { %v441_v59 = vrot.slane %v440_v58, 1 }
 0x134   : > { %v442_v60 = vadd.f32 %v441_v59, %v440_v58 }
 0x136   : > { %581 = vpush %v442_v60 }
 0x167   : > { %s582_s29 = spop %581 }
 0x168   : > { %v444_v61 = vstv %s582_s29 }
 0x169   : > { %446 = vst.msk [vmem:[%s286_s21] sm:$0x1] %vm445_vm13, %v444_v61 }
 0x16a PF: > { %s19_s17 = sadd.s32 1, %s811_s17   ;;  %s1146_s12 = smov %s795_s13 }
 0x16b   : > { %p16_p2 = scmp.ge.s32.totalorder %s19_s17, 4   ;;  %s1147_s13 = smov %s799_s14 }
 0x16c   : > { %s1148_s14 = smov %s886_s23  ;;  %s1149_s15 = smov %s807_s16 }
 0x16d   : > { %s1150_s16 = smov %s1152_s19  ;;  %18 = sbr.rel (!%p16_p2) target bundleno = 6 (0x6), region = 104 }
 0x174   :  { %464 = vsyncpa [#allocation4], 1 }
 0x175   :  { %466 = vsyncpa [#allocation4 + $0x1], 1 }
 0x176   :  { %467 = vsyncpa [#allocation6], 1 }
 0x177   :  { %469 = vsyncpa [#allocation6 + $0x1], 1 }

</bundles_post_ra>
